<compile_context>
chip_gen: v7x
topology: tpu7x:2x2x1
jax: 0.10.0
libtpu: 0.0.40
codegen_flags: <defaults>
</compile_context>

<pallas_src>
import math

import jax
import jax.numpy as jnp
from jax.experimental import pallas as pl
from jax.experimental.pallas import tpu as pltpu

LANE = 128
_STREAM_ALIGN = 256   # tk multiple: lane-aligned x minor dim, sublane-aligned wf rows
_N_GATE = 128         # gating.layer1 output width (fixed by the module)


def _round_up(a, b):
    return (a + b - 1) // b * b


def _leaky_relu(x, slope=0.01):
    return jnp.where(x > 0, x, slope * x)


def _softmax_rows(x):
    m = jnp.max(x, axis=-1, keepdims=True)
    e = jnp.exp(x - m)
    return e / jnp.sum(e, axis=-1, keepdims=True)


# ---------------------------------------------------------------------------
# Generation-aware planning
# ---------------------------------------------------------------------------
def _device_profile():
    """(vmem_limit_bytes, n_tensorcores) chosen per TPU generation."""
    kind = ""
    try:
        kind = jax.devices()[0].device_kind.lower()
    except Exception:   # conservative fallback
        pass
    if "v7" in kind or "7x" in kind:
        # 64 MiB physical VMEM per TensorCore, 2 TensorCores per chip.
        return 36 * 1024 * 1024, 2
    # v5e / v6e (and unknown): 128 MiB physical VMEM, 1 TensorCore.
    return 48 * 1024 * 1024, 1


def _choose_tiling(d, n1, b_pad, vmem_limit, n_cores, n_buffers=3):
    """Pick (P, d_pad, tk, steps_per_core) with tk an exact divisor of d_pad//P."""
    bytes_per_row = 2 * (n1 + b_pad)                     # bf16 wf row + bf16 x col-chunk
    budget = max(vmem_limit - 4 * 1024 * 1024, 2 * 1024 * 1024)
    tk_max = max(_STREAM_ALIGN,
                 budget // (n_buffers * bytes_per_row) // _STREAM_ALIGN * _STREAM_ALIGN)

    p = n_cores if d >= 2 * _STREAM_ALIGN * n_cores else 1
    d_pad = _round_up(d, _STREAM_ALIGN * p)
    dp = d_pad // p                                      # rows handled per core
    n_units = dp // _STREAM_ALIGN
    tk = _STREAM_ALIGN
    for k in range(1, n_units + 1):                      # smallest step count that fits
        if n_units % k == 0 and (n_units // k) * _STREAM_ALIGN <= tk_max:
            tk = (n_units // k) * _STREAM_ALIGN
            break
    return p, d_pad, tk, dp // tk


def _streamed_spec(block_shape, index_map, n_buffers):
    if n_buffers > 2:
        try:
            return pl.BlockSpec(block_shape, index_map,
                                pipeline_mode=pl.Buffered(n_buffers))
        except (TypeError, AttributeError):
            pass
    return pl.BlockSpec(block_shape, index_map)


def _full_spec(shape):
    zeros = (0,) * len(shape)
    return pl.BlockSpec(shape, lambda i, _z=zeros: _z)


# ---------------------------------------------------------------------------
# Kernels
# ---------------------------------------------------------------------------
def _stream_matmul_kernel(x_ref, wf_ref, part_ref):
    """partial[p] += x_chunk @ wf_chunk, f32 accumulation resident across k."""
    @pl.when(pl.program_id(1) == 0)
    def _init():
        part_ref[...] = jnp.zeros_like(part_ref)

    part_ref[...] += jnp.dot(x_ref[...], wf_ref[...],
                             preferred_element_type=jnp.float32)


def _make_finalize_kernel(num_experts, expert_hidden):
    def kernel(part_ref, bf1_ref, w2_ref, b2_ref, w3_ref, b3_ref,
               w4_ref, b4_ref, we2_ref, be2_ref, noise_ref,
               out_ref, wgate_ref):
        b_pad = out_ref.shape[0]
        e_pad = w4_ref.shape[1]
        eh_pad = we2_ref.shape[0]
        n_parts = part_ref.shape[0] // b_pad

        # Sum the per-core partial accumulators (n_parts is 1 or 2 - tiny).
        acc = part_ref[pl.ds(0, b_pad), :]
        for p in range(1, n_parts):
            acc = acc + part_ref[pl.ds(p * b_pad, b_pad), :]

        z = acc + bf1_ref[...]                      # (B, 128 + EH_pad), f32
        g1 = jnp.maximum(z[:, :_N_GATE], 0.0)       # gating relu
        eh = jnp.maximum(z[:, _N_GATE:], 0.0)       # expert hiddens (ReLU)

        # ---- gating tail (dropouts are identity in eval mode) ----
        h2 = _leaky_relu(jnp.dot(g1, w2_ref[...],
                                 preferred_element_type=jnp.float32) + b2_ref[...])
        h3 = _leaky_relu(jnp.dot(h2, w3_ref[...],
                                 preferred_element_type=jnp.float32) + b3_ref[...])
        logits = jnp.dot(h3, w4_ref[...],
                         preferred_element_type=jnp.float32) + b4_ref[...]

        # Lane-dense (B, 128) gate path; padded expert columns masked to -inf.
        col = jax.lax.broadcasted_iota(jnp.int32, (b_pad, e_pad), 1)
        valid = col < num_experts
        neg = jnp.full((b_pad, e_pad), -1e30, jnp.float32)
        w = _softmax_rows(jnp.where(valid, logits, neg))
        w = _softmax_rows(jnp.where(valid, w + noise_ref[...], neg))
        wgate_ref[...] = w                           # (B, 128), unmasked store

        # ---- weighted expert combine without materializing (B, C, E) ----
        #   out = sum_e w[:,e] * (relu(h_e) @ We2_e + be2_e)
        # Gate weights -> per-hidden-column scale via a 0/1 "expand" matmul
        # (stays on the MXU, no lane relayout), then a single lane-dense
        # contraction with the stacked second-layer weights.
        lane = jax.lax.broadcasted_iota(jnp.int32, (e_pad, eh_pad), 1)
        expert = jax.lax.broadcasted_iota(jnp.int32, (e_pad, eh_pad), 0)
        expand = ((lane >= expert * expert_hidden) &
                  (lane < (expert + 1) * expert_hidden)).astype(jnp.float32)
        scale = jnp.dot(w, expand, preferred_element_type=jnp.float32)  # (B, EH_pad)
        out = jnp.dot(eh * scale, we2_ref[...],
                      preferred_element_type=jnp.float32)
        out = out + jnp.dot(w, be2_ref[...], preferred_element_type=jnp.float32)
        out_ref[...] = out                           # (B, C_pad)

    return kernel


# ---------------------------------------------------------------------------
# One-time weight preparation (hoisted out of the forward path)
# ---------------------------------------------------------------------------
def prepare_moe(params, *, max_batch, stream_dtype=jnp.bfloat16):
    """Fuse + pad + cast the weights once; at real scale this moves more HBM
    bytes than the kernel itself streams, so it must not run per forward call."""
    d = params["w1"].shape[0]
    num_e, _, hid = params["we1"].shape
    num_cls = params["we2"].shape[-1]

    eh = num_e * hid
    eh_pad = _round_up(eh, LANE)
    n1 = _N_GATE + eh_pad
    c_pad = _round_up(num_cls, LANE)
    e_pad = LANE                                     # lane-dense gate path
    b_pad = _round_up(max(max_batch, 16), 16)        # 16 sublanes (bf16 packing)

    vmem_limit, n_cores = _device_profile()
    p, d_pad, tk, steps = _choose_tiling(d, n1, b_pad, vmem_limit, n_cores)

    # Fused first layer [gating.layer1 | expert fc1 (e-major)] -> (D_pad, N1).
    we1_cols = jnp.transpose(params["we1"], (1, 0, 2)).reshape(d, eh)
    wf = jnp.concatenate([params["w1"], we1_cols], axis=1)
    wf = jnp.pad(wf, ((0, d_pad - d), (0, eh_pad - eh))).astype(stream_dtype)
    bf1 = jnp.pad(jnp.concatenate([params["b1"], params["be1"].reshape(1, eh)],
                                  axis=1), ((0, 0), (0, eh_pad - eh)))

    we2_flat = jnp.pad(params["we2"].reshape(eh, num_cls),
                       ((0, eh_pad - eh), (0, c_pad - num_cls)))
    be2_mat = jnp.pad(params["be2"].reshape(num_e, num_cls),
                      ((0, e_pad - num_e), (0, c_pad - num_cls)))
    w4 = jnp.pad(params["w4"], ((0, 0), (0, e_pad - num_e)))
    b4 = jnp.pad(params["b4"], ((0, 0), (0, e_pad - num_e)))

    prepared = {
        "wf": wf, "bf1": bf1,
        "w2": params["w2"], "b2": params["b2"],
        "w3": params["w3"], "b3": params["b3"],
        "w4": w4, "b4": b4,
        "we2": we2_flat, "be2": be2_mat,
    }
    cfg = dict(d=d, num_experts=num_e, expert_hidden=hid, num_classes=num_cls,
               eh_pad=eh_pad, n1=n1, c_pad=c_pad, e_pad=e_pad, b_pad=b_pad,
               d_pad=d_pad, tk=tk, p=p, steps=steps, vmem_limit=vmem_limit,
               stream_dtype=stream_dtype)
    return prepared, cfg


# ---------------------------------------------------------------------------
# Forward
# ---------------------------------------------------------------------------
def moe_forward(x, prepared, cfg, noise):
    """x: (B, C_img, H_img, W_img) f32. Returns (moe_out (B,C), weights (B,C,E))."""
    b = x.shape[0]
    d, d_pad, b_pad = cfg["d"], cfg["d_pad"], cfg["b_pad"]
    n1, tk, p, steps = cfg["n1"], cfg["tk"], cfg["p"], cfg["steps"]
    e_pad, c_pad = cfg["e_pad"], cfg["c_pad"]
    num_e, num_cls = cfg["num_experts"], cfg["num_classes"]
    assert b <= b_pad, "batch larger than the prepared max_batch"

    x_flat = x.reshape(b, -1)
    assert x_flat.shape[1] == d
    xp = jnp.pad(x_flat, ((0, b_pad - b), (0, d_pad - d))).astype(cfg["stream_dtype"])
    noise_p = jnp.pad(noise.astype(jnp.float32),
                      ((0, b_pad - b), (0, e_pad - num_e)))

    n_buffers = 3 if steps >= 3 else 2

    # ---- pass 1: streamed fused first-layer matmul (HBM-BW bound) ----
    stream_cost = pl.CostEstimate(
        flops=int(2 * b_pad * d_pad * n1),
        transcendentals=0,
        bytes_accessed=int(xp.size * xp.dtype.itemsize
                           + prepared["wf"].size * prepared["wf"].dtype.itemsize
                           + p * b_pad * n1 * 4))
    partials = pl.pallas_call(
        _stream_matmul_kernel,
        out_shape=jax.ShapeDtypeStruct((p * b_pad, n1), jnp.float32),
        grid=(p, steps),
        in_specs=[
            _streamed_spec((b_pad, tk), lambda pi, k, s=steps: (0, pi * s + k),
                           n_buffers),
            _streamed_spec((tk, n1), lambda pi, k, s=steps: (pi * s + k, 0),
                           n_buffers),
        ],
        out_specs=pl.BlockSpec((b_pad, n1), lambda pi, k: (pi, 0)),
        compiler_params=pltpu.CompilerParams(
            # Leading axis shards the D-reduction across v7x's two TensorCores
            # (size 1 elsewhere); within a core the D axis is a reduction.
            dimension_semantics=("parallel", "arbitrary"),
            vmem_limit_bytes=cfg["vmem_limit"]),
        cost_estimate=stream_cost,
    )(xp, prepared["wf"])

    # ---- pass 2: tiny finalize (gating tail + weighted expert combine) ----
    fin_inputs = (partials, prepared["bf1"], prepared["w2"], prepared["b2"],
                  prepared["w3"], prepared["b3"], prepared["w4"], prepared["b4"],
                  prepared["we2"], prepared["be2"], noise_p)
    out_p, w_p = pl.pallas_call(
        _make_finalize_kernel(num_e, cfg["expert_hidden"]),
        out_shape=(jax.ShapeDtypeStruct((b_pad, c_pad), jnp.float32),
                   jax.ShapeDtypeStruct((b_pad, e_pad), jnp.float32)),
        grid=(1,),
        in_specs=[_full_spec(a.shape) for a in fin_inputs],
        out_specs=(_full_spec((b_pad, c_pad)), _full_spec((b_pad, e_pad))),
        compiler_params=pltpu.CompilerParams(
            dimension_semantics=("arbitrary",)),
    )(*fin_inputs)

    moe_out = out_p[:b, :num_cls]
    w_gate = w_p[:b, :num_e]
    # The PyTorch module returns the gate weights broadcast to (B, C, E);
    # that amplification is a free XLA broadcast in the wrapper.
    weights_full = jnp.broadcast_to(w_gate[:, None, :], (b, num_cls, num_e))
    return moe_out, weights_full


# ---------------------------------------------------------------------------
# Params / reference / test
# ---------------------------------------------------------------------------
def init_params(key, input_dim, num_experts, expert_hidden, num_classes):
    """Deterministic torch-Linear-style init: U(-1/sqrt(fan_in), 1/sqrt(fan_in))."""
    def linear(k, fan_in, fan_out):
        kw, kb = jax.random.split(k)
        bound = 1.0 / jnp.sqrt(fan_in)
        w = jax.random.uniform(kw, (fan_in, fan_out), jnp.float32, -bound, bound)
        b = jax.random.uniform(kb, (1, fan_out), jnp.float32, -bound, bound)
        return w, b

    keys = jax.random.split(key, 4 + 2 * num_experts)
    w1, b1 = linear(keys[0], input_dim, 128)
    w2, b2 = linear(keys[1], 128, 256)
    w3, b3 = linear(keys[2], 256, 128)
    w4, b4 = linear(keys[3], 128, num_experts)

    we1, be1, we2, be2 = [], [], [], []
    for e in range(num_experts):
        we, be = linear(keys[4 + 2 * e], input_dim, expert_hidden)
        wo, bo = linear(keys[5 + 2 * e], expert_hidden, num_classes)
        we1.append(we); be1.append(be); we2.append(wo); be2.append(bo)

    return {
        "w1": w1, "b1": b1, "w2": w2, "b2": b2,
        "w3": w3, "b3": b3, "w4": w4, "b4": b4,
        "we1": jnp.stack(we1),              # (E, D, H)
        "be1": jnp.stack(be1),              # (E, 1, H)
        "we2": jnp.stack(we2),              # (E, H, C)
        "be2": jnp.stack(be2),              # (E, 1, C)
    }


def moe_reference(x, params, noise):
    """Pure-JAX reference mirroring the kernel's bf16 first-layer streaming."""
    B = x.shape[0]
    D = math.prod(x.shape[1:])
    xb = x.reshape(B, D).astype(jnp.bfloat16)

    h = jnp.dot(xb, params["w1"].astype(jnp.bfloat16),
                preferred_element_type=jnp.float32) + params["b1"]
    h = jnp.maximum(h, 0.0)
    h = _leaky_relu(jnp.dot(h, params["w2"]) + params["b2"])
    h = _leaky_relu(jnp.dot(h, params["w3"]) + params["b3"])
    w = jax.nn.softmax(jnp.dot(h, params["w4"]) + params["b4"], axis=1)
    w = jax.nn.softmax(w + noise, axis=1)

    outs = []
    for e in range(params["we1"].shape[0]):
        he = jnp.dot(xb, params["we1"][e].astype(jnp.bfloat16),
                     preferred_element_type=jnp.float32) + params["be1"][e]
        he = jnp.maximum(he, 0.0)
        outs.append(jnp.dot(he, params["we2"][e]) + params["be2"][e])
    outputs = jnp.stack(outs, axis=2)                       # (B, C, E)
    wexp = jnp.broadcast_to(w[:, None, :], outputs.shape)
    return jnp.sum(outputs * wexp, axis=2), wexp


if __name__ == "__main__":
    key = jax.random.PRNGKey(0)
    k_x, k_p, k_n = jax.random.split(key, 3)

    B, C_IMG, H_IMG, W_IMG = 2, 3, 16, 16          # small stand-in for (B, 3, 224, 224)
    NUM_EXPERTS, EXPERT_HIDDEN, NUM_CLASSES = 4, 32, 8
    D = C_IMG * H_IMG * W_IMG

    x = jax.random.normal(k_x, (B, C_IMG, H_IMG, W_IMG), jnp.float32)
    params = init_params(k_p, D, NUM_EXPERTS, EXPERT_HIDDEN, NUM_CLASSES)
    # torch.randn_like(weights) * 0.01, generated host-side.
    noise = jax.random.normal(k_n, (B, NUM_EXPERTS), jnp.float32) * 0.01

    # One-time weight fusion/cast (cache this at real scale - see comments).
    prepared, cfg = prepare_moe(params, max_batch=B)

    out, weights = moe_forward(x, prepared, cfg, noise)
    jax.block_until_ready((out, weights))

    assert out.shape == (B, NUM_CLASSES)
    assert weights.shape == (B, NUM_CLASSES, NUM_EXPERTS)
    assert bool(jnp.all(jnp.isfinite(out))) and bool(jnp.all(jnp.isfinite(weights)))

    # Cross-check against a pure-JAX reference (same bf16 streaming choice).
    ref_out, ref_w = moe_reference(x, params, noise)
    err_out = float(jnp.max(jnp.abs(out - ref_out)))
    err_w = float(jnp.max(jnp.abs(weights - ref_w)))
    assert err_out < 5e-2 and err_w < 5e-2, (err_out, err_w)

    print("KERNEL_OK")
</pallas_src>

<mosaic_0001>
module attributes {stable_mosaic.version = 11 : i64} {
  func.func @_stream_matmul_kernel(%arg0: i32, %arg1: i32, %arg2: memref<16x768xbf16, #tpu.memory_space<vmem>>, %arg3: memref<768x256xbf16, #tpu.memory_space<vmem>>, %arg4: memref<16x256xf32, #tpu.memory_space<vmem>>) attributes {dimension_semantics = [#tpu.dimension_semantics<parallel>, #tpu.dimension_semantics<arbitrary>], iteration_bounds = array<i64: 1, 1>, scalar_prefetch = 0 : i64, scratch_operands = 0 : i64, tpu.core_type = #tpu.core_type<tc>, window_params = [{transform_indices = @transform_0, window_bounds = array<i64: 16, 768>}, {transform_indices = @transform_1, window_bounds = array<i64: 768, 256>}, {transform_indices = @transform_2, window_bounds = array<i64: 16, 256>}]} {
    %c0_i32 = arith.constant 0 : i32
    %0 = arith.cmpi eq, %arg1, %c0_i32 : i32
    %1 = arith.extui %0 : i1 to i32
    %c0_i32_0 = arith.constant 0 : i32
    %2 = arith.cmpi ne, %1, %c0_i32_0 : i32
    scf.if %2 {
      %cst_8 = arith.constant 0.000000e+00 : f32
      %9 = vector.broadcast %cst_8 : f32 to vector<16x256xf32>
      %c0_9 = arith.constant 0 : index
      %c0_10 = arith.constant 0 : index
      %10 = vector.load %arg4[%c0_9, %c0_10] : memref<16x256xf32, #tpu.memory_space<vmem>>, vector<16x256xf32>
      tpu.vector_store %arg4[%c0_9, %c0_10], %9 {strides = array<i32>} : memref<16x256xf32, #tpu.memory_space<vmem>>, vector<16x256xf32>,
    } else {
    }
    %c0 = arith.constant 0 : index
    %c0_1 = arith.constant 0 : index
    %3 = vector.load %arg4[%c0, %c0_1] : memref<16x256xf32, #tpu.memory_space<vmem>>, vector<16x256xf32>
    %c0_2 = arith.constant 0 : index
    %c0_3 = arith.constant 0 : index
    %4 = vector.load %arg2[%c0_2, %c0_3] : memref<16x768xbf16, #tpu.memory_space<vmem>>, vector<16x768xbf16>
    %c0_4 = arith.constant 0 : index
    %c0_5 = arith.constant 0 : index
    %5 = vector.load %arg3[%c0_4, %c0_5] : memref<768x256xbf16, #tpu.memory_space<vmem>>, vector<768x256xbf16>
    %cst = arith.constant dense<0.000000e+00> : vector<16x256xf32>
    %6 = tpu.matmul %4, %5, %cst {dimension_numbers = #tpu.dot_dimension_numbers<[1], [0], [0], [1], [0, 0, 1, 1], [], []>} : vector<16x768xbf16>, vector<768x256xbf16>, vector<16x256xf32> -> vector<16x256xf32>
    %7 = arith.addf %3, %6 : vector<16x256xf32>
    %c0_6 = arith.constant 0 : index
    %c0_7 = arith.constant 0 : index
    %8 = vector.load %arg4[%c0_6, %c0_7] : memref<16x256xf32, #tpu.memory_space<vmem>>, vector<16x256xf32>
    tpu.vector_store %arg4[%c0_6, %c0_7], %7 {strides = array<i32>} : memref<16x256xf32, #tpu.memory_space<vmem>>, vector<16x256xf32>,
    return
  }
  func.func @transform_0(%arg0: i32, %arg1: i32) -> (i32, i32) {
    %c1_i32 = arith.constant 1 : i32
    %0 = arith.muli %arg0, %c1_i32 : i32
    %1 = arith.addi %0, %arg1 : i32
    %c0_i32 = arith.constant 0 : i32
    %c0_i32_0 = arith.constant 0 : i32
    return %c0_i32, %1 : i32, i32
  }
  func.func @transform_1(%arg0: i32, %arg1: i32) -> (i32, i32) {
    %c1_i32 = arith.constant 1 : i32
    %0 = arith.muli %arg0, %c1_i32 : i32
    %1 = arith.addi %0, %arg1 : i32
    %c0_i32 = arith.constant 0 : i32
    %c0_i32_0 = arith.constant 0 : i32
    return %1, %c0_i32 : i32, i32
  }
  func.func @transform_2(%arg0: i32, %arg1: i32) -> (i32, i32) {
    %c0_i32 = arith.constant 0 : i32
    %c0_i32_0 = arith.constant 0 : i32
    return %arg0, %c0_i32 : i32, i32
  }
}

</mosaic_0001>

<bundles_post_ra>
// kernel: tpu_custom_call.1
= control target key start
LH: loop header
LB: loop body
LE: loop exit
PB: predicated region body
PF: predicated region fallthrough
CT: control target
= control target key end

     0   :  { %7 = vsyncpa [#allocation3], 0  ;;  %s1237_s0 = inlined_call_operand.hbm [shape: bf16[16,768], index: 0, kind: input, shape index: {}]   ;;  %s1238_s1 = inlined_call_operand.hbm [shape: bf16[768,256], index: 1, kind: input, shape index: {}]   ;;  %s1239_s2 = inlined_call_operand.hbm [shape: f32[16,256], index: 2, kind: output, shape index: {}]  }
   0x1   :  { %8 = vsyncpa [#allocation6], 0 }
   0x2   :  { %9 = vsyncpa [#allocation4], 0  ;;  %s1177_s9 = smov [#allocation2]   ;;  %s1105_s13 = scalar_lea.hbm %s1237_s0, 768 }
   0x3   :  { %s19_s10 = sshll.u32 %s1177_s9, 4  ;;  %p1106_p0 = scmp.ne.s32.totalorder %s1237_s0, %s1105_s13  ;;  %s20_s10 = int_to_ptr.vmem [resolvable:$true] %s19_s10 }
   0x4   :  { %p1109_p1 = scmp.lt.u32.totalorder %s1105_s13, %s1237_s0 }
   0x6   :  { %p1111_p2 = pnand %p1109_p1, %p1106_p0 }
   0x8   :  { %1114 = shalt.err (!%p1111_p2)
}
   0x9   :  { %s1115_s18 = scalar_lea.vmem %s20_s10, 768  ;;  %p1120_p4 = scmp.lt.s32.totalorder %s20_s10, %s20_s10 }
   0xa   :  { %p1116_p3 = scmp.ne.s32.totalorder %s20_s10, %s1115_s18  ;;  %p1121_p5 = scmp.lt.s32.totalorder %s1115_s18, %s1115_s18 }
   0xc   :  { %p1122_p6 = por %p1121_p5, %p1120_p4 }
   0xe   :  { %p1123_p7 = pnand %p1122_p6, %p1116_p3 }
  0x10   :  { %1126 = shalt.err (!%p1123_p7)
}
  0x11   :  { %s1178_s19 = smov 384   ;;  %s1179_s20 = smov 24  }
  0x12   :  { %25 = dma.hbm_to_vmem [thread:$0]  %s1237_s0, 768, %s20_s10, [#allocation3], %s1178_s19, %s1178_s19, %s1179_s20  }
  0x13   :  { %s1180_s23 = smov [#allocation5]   ;;  %s1127_s27 = scalar_lea.hbm %s1238_s1, 12288 }
  0x14   :  { %s36_s24 = sshll.u32 %s1180_s23, 4  ;;  %p1128_p8 = scmp.ne.s32.totalorder %s1238_s1, %s1127_s27  ;;  %s37_s24 = int_to_ptr.vmem [resolvable:$true] %s36_s24 }
  0x15   :  { %p1131_p9 = scmp.lt.u32.totalorder %s1127_s27, %s1238_s1 }
  0x17   :  { %p1133_p10 = pnand %p1131_p9, %p1128_p8 }
  0x19   :  { %1136 = shalt.err (!%p1133_p10)
}
  0x1a   :  { %s1137_s4 = scalar_lea.vmem %s37_s24, 12288  ;;  %p1142_p12 = scmp.lt.s32.totalorder %s37_s24, %s37_s24 }
  0x1b   :  { %p1138_p11 = scmp.ne.s32.totalorder %s37_s24, %s1137_s4  ;;  %p1143_p13 = scmp.lt.s32.totalorder %s1137_s4, %s1137_s4 }
  0x1d   :  { %p1144_p0 = por %p1143_p13, %p1142_p12 }
  0x1f   :  { %p1145_p1 = pnand %p1144_p0, %p1138_p11 }
  0x21   :  { %1148 = shalt.err (!%p1145_p1)
}
  0x22   :  { %s1181_s0 = smov 128   ;;  %s1182_s5 = smov 8  }
  0x23   :  { %42 = dma.hbm_to_vmem [thread:$0]  %s1238_s1, 12288, %s37_s24, [#allocation6], %s1181_s0, %s1181_s0, %s1182_s5  }
  0x24   :  { %1171 = dma.done.wait [#allocation3], 768  }
  0x25   :  { %1172 = vsyncadd [#allocation3], 4294966528 }
  0x26   :  { %1173 = dma.done.wait [#allocation6], 12288  }
  0x27   :  { %1174 = vsyncadd [#allocation6], 4294955008  ;;  %v952_v0 = vld [vmem:[#allocation5 + $0x104] ss:$8 sps:$4 sm:$0xff]   ;;  %v954_v1 = vld [vmem:[#allocation5 + $0x100] ss:$8 sps:$4 sm:$0xff]  }
  0x28   :  { %720 = vmatprep.subr.bf16.mxu0 %v952_v0  ;;  %v955_v2 = vld [vmem:[#allocation5 + $0x114] ss:$8 sps:$4 sm:$0xff]   ;;  %v957_v3 = vld [vmem:[#allocation5 + $0x110] ss:$8 sps:$4 sm:$0xff]   ;;  %v958_v4 = vld [vmem:[#allocation5 + $0x124] ss:$8 sps:$4 sm:$0xff]  }
  0x29   :  { %721 = vmatpush1.bf16.msra.mxu0 %v954_v1  ;;  %v960_v5 = vld [vmem:[#allocation5 + $0x120] ss:$8 sps:$4 sm:$0xff]   ;;  %v961_v6 = vld [vmem:[#allocation5 + $0x134] ss:$8 sps:$4 sm:$0xff]   ;;  %v963_v7 = vld [vmem:[#allocation5 + $0x130] ss:$8 sps:$4 sm:$0xff]  }
  0x2a   :  { %722 = vmatprep.subr.bf16.mxu0 %v955_v2  ;;  %v964_v8 = vld [vmem:[#allocation5 + $0x144] ss:$8 sps:$4 sm:$0xff]   ;;  %v966_v9 = vld [vmem:[#allocation5 + $0x140] ss:$8 sps:$4 sm:$0xff]   ;;  %v967_v10 = vld [vmem:[#allocation5 + $0x154] ss:$8 sps:$4 sm:$0xff]  }
  0x2b   :  { %v969_v11 = vld [vmem:[#allocation5 + $0x150] ss:$8 sps:$4 sm:$0xff]   ;;  %v970_v12 = vld [vmem:[#allocation5 + $0x164] ss:$8 sps:$4 sm:$0xff]   ;;  %v1002_v14 = vld [vmem:[#allocation5] ss:$8 sps:$4 sm:$0xff]  }
  0x2c   :  { %v999_v13 = vld [vmem:[#allocation5 + $0x4] ss:$8 sps:$4 sm:$0xff]   ;;  %v972_v15 = vld [vmem:[#allocation5 + $0x160] ss:$8 sps:$4 sm:$0xff]   ;;  %v1005_v16 = vld [vmem:[#allocation2 + $0xc] ss:$24 sps:$4 sm:$0xff]  }
  0x2d   :  { %723 = vmatpush1.bf16.msra.mxu0 %v957_v3  ;;  %677 = vmatprep.subr.bf16.mxu1 %v999_v13  ;;  %v973_v17 = vld [vmem:[#allocation5 + $0x174] ss:$8 sps:$4 sm:$0xff]   ;;  %v1011_v19 = vld [vmem:[#allocation5 + $0x10] ss:$8 sps:$4 sm:$0xff]   ;;  %v976_v21 = vld [vmem:[#allocation5 + $0x184] ss:$8 sps:$4 sm:$0xff]  }
  0x2e   :  { %724 = vmatprep.subr.bf16.mxu0 %v958_v4  ;;  %678 = vmatpush1.bf16.msra.mxu1 %v1002_v14  ;;  %v1009_v18 = vld [vmem:[#allocation5 + $0x14] ss:$8 sps:$4 sm:$0xff]   ;;  %v975_v20 = vld [vmem:[#allocation5 + $0x170] ss:$8 sps:$4 sm:$0xff]   ;;  %v1015_v22 = vld [vmem:[#allocation5 + $0x24] ss:$8 sps:$4 sm:$0xff]  }
  0x2f   :  { %752 = vmatprep.mubr.bf16.mxu0 %v1005_v16  ;;  %679 = vmatprep.subr.bf16.mxu1 %v1009_v18  ;;  %v1017_v23 = vld [vmem:[#allocation5 + $0x20] ss:$8 sps:$4 sm:$0xff]   ;;  %v1021_v25 = vld [vmem:[#allocation5 + $0x34] ss:$8 sps:$4 sm:$0xff]   ;;  %v1023_v27 = vld [vmem:[#allocation5 + $0x30] ss:$8 sps:$4 sm:$0xff]  }
  0x30   :  { %v978_v24 = vld [vmem:[#allocation5 + $0x180] ss:$8 sps:$4 sm:$0xff]   ;;  %v979_v26 = vld [vmem:[#allocation5 + $0x194] ss:$8 sps:$4 sm:$0xff]   ;;  %v1027_v28 = vld [vmem:[#allocation5 + $0x44] ss:$8 sps:$4 sm:$0xff]  }
  0x31   :  { %725 = vmatpush1.bf16.msra.mxu0 %v960_v5  ;;  %v981_v29 = vld [vmem:[#allocation5 + $0x190] ss:$8 sps:$4 sm:$0xff]   ;;  %v982_v30 = vld [vmem:[#allocation5 + $0x1a4] ss:$8 sps:$4 sm:$0xff]   ;;  %v1029_v31 = vld [vmem:[#allocation5 + $0x40] ss:$8 sps:$4 sm:$0xff]  }
  0x32   :  { %726 = vmatprep.subr.bf16.mxu0 %v961_v6  ;;  %680 = vmatpush1.bf16.msra.mxu1 %v1011_v19  ;;  %v1033_v32 = vld [vmem:[#allocation5 + $0x54] ss:$8 sps:$4 sm:$0xff]   ;;  %v984_v33 = vld [vmem:[#allocation5 + $0x1a0] ss:$8 sps:$4 sm:$0xff]   ;;  %v1035_v35 = vld [vmem:[#allocation5 + $0x50] ss:$8 sps:$4 sm:$0xff]  }
  0x33   :  { %681 = vmatprep.subr.bf16.mxu1 %v1015_v22  ;;  %v985_v34 = vld [vmem:[#allocation5 + $0x1b4] ss:$8 sps:$4 sm:$0xff]   ;;  %v1039_v36 = vld [vmem:[#allocation5 + $0x64] ss:$8 sps:$4 sm:$0xff]   ;;  %v987_v37 = vld [vmem:[#allocation5 + $0x1b0] ss:$8 sps:$4 sm:$0xff]  }
  0x34   :  { %v988_v38 = vld [vmem:[#allocation5 + $0x1c4] ss:$8 sps:$4 sm:$0xff]   ;;  %v1041_v39 = vld [vmem:[#allocation5 + $0x60] ss:$8 sps:$4 sm:$0xff]   ;;  %v1045_v40 = vld [vmem:[#allocation5 + $0x74] ss:$8 sps:$4 sm:$0xff]  }
  0x35   :  { %727 = vmatpush1.bf16.msra.mxu0 %v963_v7  ;;  %v990_v41 = vld [vmem:[#allocation5 + $0x1c0] ss:$8 sps:$4 sm:$0xff]   ;;  %v991_v42 = vld [vmem:[#allocation5 + $0x1d4] ss:$8 sps:$4 sm:$0xff]   ;;  %v1047_v43 = vld [vmem:[#allocation5 + $0x70] ss:$8 sps:$4 sm:$0xff]  }
  0x36   :  { %728 = vmatprep.subr.bf16.mxu0 %v964_v8  ;;  %682 = vmatpush1.bf16.msra.mxu1 %v1017_v23  ;;  %v1051_v44 = vld [vmem:[#allocation5 + $0x84] ss:$8 sps:$4 sm:$0xff]   ;;  %v993_v45 = vld [vmem:[#allocation5 + $0x1d0] ss:$8 sps:$4 sm:$0xff]   ;;  %v1053_v47 = vld [vmem:[#allocation5 + $0x80] ss:$8 sps:$4 sm:$0xff]  }
  0x37   :  { %683 = vmatprep.subr.bf16.mxu1 %v1021_v25  ;;  %v994_v46 = vld [vmem:[#allocation5 + $0x1e4] ss:$8 sps:$4 sm:$0xff]   ;;  %v1057_v48 = vld [vmem:[#allocation5 + $0x94] ss:$8 sps:$4 sm:$0xff]   ;;  %v996_v49 = vld [vmem:[#allocation5 + $0x1e0] ss:$8 sps:$4 sm:$0xff]  }
  0x38   :  { %v997_v50 = vld [vmem:[#allocation5 + $0x1f4] ss:$8 sps:$4 sm:$0xff]   ;;  %v1059_v51 = vld [vmem:[#allocation5 + $0x90] ss:$8 sps:$4 sm:$0xff]   ;;  %v1063_v52 = vld [vmem:[#allocation5 + $0xa4] ss:$8 sps:$4 sm:$0xff]  }
  0x39   :  { %729 = vmatpush1.bf16.msra.mxu0 %v966_v9  ;;  %v1001_v53 = vld [vmem:[#allocation5 + $0x1f0] ss:$8 sps:$4 sm:$0xff]   ;;  %v1008_v54 = vld [vmem:[#allocation5 + $0x204] ss:$8 sps:$4 sm:$0xff]   ;;  %v1065_v55 = vld [vmem:[#allocation5 + $0xa0] ss:$8 sps:$4 sm:$0xff]  }
  0x3a   :  { %730 = vmatprep.subr.bf16.mxu0 %v967_v10  ;;  %684 = vmatpush1.bf16.msra.mxu1 %v1023_v27  ;;  %v1003_v56 = vld [vmem:[#allocation2 + $0x8] ss:$24 sps:$4 sm:$0xff]   ;;  %v1069_v57 = vld [vmem:[#allocation5 + $0xb4] ss:$8 sps:$4 sm:$0xff]   ;;  %v1006_v58 = vld [vmem:[#allocation5 + $0x200] ss:$8 sps:$4 sm:$0xff]  }
  0x3b   :  { %685 = vmatprep.subr.bf16.mxu1 %v1027_v28  ;;  %v1014_v59 = vld [vmem:[#allocation5 + $0x214] ss:$8 sps:$4 sm:$0xff]   ;;  %v1071_v60 = vld [vmem:[#allocation5 + $0xb0] ss:$8 sps:$4 sm:$0xff]   ;;  %v1075_v62 = vld [vmem:[#allocation5 + $0xc4] ss:$8 sps:$4 sm:$0xff]  }
  0x3c   :  { %v1098_v61 = vld [vmem:[#allocation2 + $0x4] ss:$24 sps:$4 sm:$0xff]   ;;  %v1012_v63 = vld [vmem:[#allocation5 + $0x210] ss:$8 sps:$4 sm:$0xff]   ;;  %v1104_v0 = vld [vmem:[#allocation2 + $0x14] ss:$24 sps:$4 sm:$0xff]  }
  0x3d   :  { %731 = vmatpush1.bf16.msra.mxu0 %v969_v11  ;;  %709 = vmatprep.mubr.bf16.mxu1 %v1098_v61  ;;  %v1020_v1 = vld [vmem:[#allocation5 + $0x224] ss:$8 sps:$4 sm:$0xff]   ;;  %v1077_v2 = vld [vmem:[#allocation5 + $0xc0] ss:$8 sps:$4 sm:$0xff]   ;;  %v1081_v3 = vld [vmem:[#allocation5 + $0xd4] ss:$8 sps:$4 sm:$0xff]  }
  0x3e   :  { %732 = vmatprep.subr.bf16.mxu0 %v970_v12  ;;  %686 = vmatpush1.bf16.msra.mxu1 %v1029_v31  ;;  %v1018_v4 = vld [vmem:[#allocation5 + $0x220] ss:$8 sps:$4 sm:$0xff]   ;;  %v1026_v5 = vld [vmem:[#allocation5 + $0x234] ss:$8 sps:$4 sm:$0xff]   ;;  %v1083_v6 = vld [vmem:[#allocation5 + $0xd0] ss:$8 sps:$4 sm:$0xff]  }
  0x3f   :  { %687 = vmatprep.subr.bf16.mxu1 %v1033_v32  ;;  %v1087_v7 = vld [vmem:[#allocation5 + $0xe4] ss:$8 sps:$4 sm:$0xff]   ;;  %v1024_v8 = vld [vmem:[#allocation5 + $0x230] ss:$8 sps:$4 sm:$0xff]   ;;  %v1089_v10 = vld [vmem:[#allocation5 + $0xe0] ss:$8 sps:$4 sm:$0xff]  }
  0x40   :  { %v1032_v9 = vld [vmem:[#allocation5 + $0x244] ss:$8 sps:$4 sm:$0xff]   ;;  %v1093_v11 = vld [vmem:[#allocation5 + $0xf4] ss:$8 sps:$4 sm:$0xff]   ;;  %v1030_v12 = vld [vmem:[#allocation5 + $0x240] ss:$8 sps:$4 sm:$0xff]  }
  0x41   :  { %733 = vmatpush1.bf16.msra.mxu0 %v972_v15  ;;  %v1038_v13 = vld [vmem:[#allocation5 + $0x254] ss:$8 sps:$4 sm:$0xff]   ;;  %v1095_v14 = vld [vmem:[#allocation5 + $0xf0] ss:$8 sps:$4 sm:$0xff]   ;;  %v1044_v16 = vld [vmem:[#allocation5 + $0x264] ss:$8 sps:$4 sm:$0xff]  }
  0x42   :  { %734 = vmatprep.subr.bf16.mxu0 %v973_v17  ;;  %688 = vmatpush1.bf16.msra.mxu1 %v1035_v35  ;;  %v1036_v15 = vld [vmem:[#allocation5 + $0x250] ss:$8 sps:$4 sm:$0xff]   ;;  %v1042_v18 = vld [vmem:[#allocation5 + $0x260] ss:$8 sps:$4 sm:$0xff]   ;;  %v1050_v19 = vld [vmem:[#allocation5 + $0x274] ss:$8 sps:$4 sm:$0xff]  }
  0x43   :  { %689 = vmatprep.subr.bf16.mxu1 %v1039_v36  ;;  %v1096_v17 = vld [vmem:[#allocation2] ss:$24 sps:$4 sm:$0xff]   ;;  %v1062_v23 = vld [vmem:[#allocation5 + $0x294] ss:$8 sps:$4 sm:$0xff]   ;;  %v1068_v25 = vld [vmem:[#allocation5 + $0x2a4] ss:$8 sps:$4 sm:$0xff]  }
  0x44   :  { %v1054_v22 = vld [vmem:[#allocation5 + $0x280] ss:$8 sps:$4 sm:$0xff]   ;;  %v1074_v27 = vld [vmem:[#allocation5 + $0x2b4] ss:$8 sps:$4 sm:$0xff]   ;;  %v1072_v28 = vld [vmem:[#allocation5 + $0x2b0] ss:$8 sps:$4 sm:$0xff]  }
  0x45   :  { %735 = vmatpush1.bf16.msra.mxu0 %v975_v20  ;;  %v1048_v20 = vld [vmem:[#allocation5 + $0x270] ss:$8 sps:$4 sm:$0xff]   ;;  %v1086_v31 = vld [vmem:[#allocation5 + $0x2d4] ss:$8 sps:$4 sm:$0xff]   ;;  %s1183_s1 = smov [#allocation7]  }
  0x46   :  { %736 = vmatprep.subr.bf16.mxu0 %v976_v21  ;;  %690 = vmatpush1.bf16.msra.mxu1 %v1041_v39  ;;  %v1056_v21 = vld [vmem:[#allocation5 + $0x284] ss:$8 sps:$4 sm:$0xff]   ;;  %v1084_v32 = vld [vmem:[#allocation5 + $0x2d0] ss:$8 sps:$4 sm:$0xff]   ;;  %v1101_v35 = vld [vmem:[#allocation5 + $0x2f4] ss:$8 sps:$4 sm:$0xff]  }
  0x47   :  { %691 = vmatprep.subr.bf16.mxu1 %v1045_v40  ;;  %v1099_v36 = vld [vmem:[#allocation5 + $0x2f0] ss:$8 sps:$4 sm:$0xff]   ;;  %s819_s8 = sshll.u32 %s1183_s1, 4  ;;  %s820_s8 = int_to_ptr.vmem [resolvable:$true] %s819_s8 }
  0x48   :  { %s1149_s9 = scalar_lea.vmem %s820_s8, 512  ;;  %p1154_p3 = scmp.lt.s32.totalorder %s820_s8, %s820_s8 }
  0x49   :  { %737 = vmatpush1.bf16.msra.mxu0 %v978_v24  ;;  %v1060_v24 = vld [vmem:[#allocation5 + $0x290] ss:$8 sps:$4 sm:$0xff]   ;;  %p1150_p2 = scmp.ne.s32.totalorder %s820_s8, %s1149_s9  ;;  %p1155_p4 = scmp.lt.s32.totalorder %s1149_s9, %s1149_s9 }
  0x4a   :  { %738 = vmatprep.subr.bf16.mxu0 %v979_v26  ;;  %692 = vmatpush1.bf16.msra.mxu1 %v1047_v43  ;;  %v1066_v26 = vld [vmem:[#allocation5 + $0x2a0] ss:$8 sps:$4 sm:$0xff]  }
  0x4b   :  { %693 = vmatprep.subr.bf16.mxu1 %v1051_v44  ;;  %p1156_p5 = por %p1155_p4, %p1154_p3 }
  0x4d   :  { %739 = vmatpush1.bf16.msra.mxu0 %v981_v29  ;;  %v1080_v29 = vld [vmem:[#allocation5 + $0x2c4] ss:$8 sps:$4 sm:$0xff]   ;;  %p1157_p6 = pnand %p1156_p5, %p1150_p2 }
  0x4e   :  { %740 = vmatprep.subr.bf16.mxu0 %v982_v30  ;;  %694 = vmatpush1.bf16.msra.mxu1 %v1053_v47  ;;  %v1078_v30 = vld [vmem:[#allocation5 + $0x2c0] ss:$8 sps:$4 sm:$0xff]  }
  0x4f   :  { %695 = vmatprep.subr.bf16.mxu1 %v1057_v48 }
  0x51   :  { %741 = vmatpush1.bf16.msra.mxu0 %v984_v33  ;;  %v1092_v33 = vld [vmem:[#allocation5 + $0x2e4] ss:$8 sps:$4 sm:$0xff]  }
  0x52   :  { %742 = vmatprep.subr.bf16.mxu0 %v985_v34  ;;  %696 = vmatpush1.bf16.msra.mxu1 %v1059_v51  ;;  %v1090_v34 = vld [vmem:[#allocation5 + $0x2e0] ss:$8 sps:$4 sm:$0xff]  }
  0x53   :  { %697 = vmatprep.subr.bf16.mxu1 %v1063_v52 }
  0x55   :  { %743 = vmatpush1.bf16.msra.mxu0 %v987_v37  ;;  %v1102_v37 = vld [vmem:[#allocation2 + $0x10] ss:$24 sps:$4 sm:$0xff]  }
  0x56   :  { %744 = vmatprep.subr.bf16.mxu0 %v988_v38  ;;  %698 = vmatpush1.bf16.msra.mxu1 %v1065_v55 }
  0x57   :  { %699 = vmatprep.subr.bf16.mxu1 %v1069_v57 }
  0x59   :  { %745 = vmatpush1.bf16.msra.mxu0 %v990_v41 }
  0x5a   :  { %746 = vmatprep.subr.bf16.mxu0 %v991_v42  ;;  %700 = vmatpush1.bf16.msra.mxu1 %v1071_v60 }
  0x5b   :  { %701 = vmatprep.subr.bf16.mxu1 %v1075_v62 }
  0x5d   :  { %747 = vmatpush1.bf16.msra.mxu0 %v993_v45 }
  0x5e   :  { %748 = vmatprep.subr.bf16.mxu0 %v994_v46  ;;  %702 = vmatpush1.bf16.msra.mxu1 %v1077_v2 }
  0x5f   :  { %703 = vmatprep.subr.bf16.mxu1 %v1081_v3 }
  0x61   :  { %749 = vmatpush1.bf16.msra.mxu0 %v996_v49 }
  0x62   :  { %750 = vmatprep.subr.bf16.mxu0 %v997_v50  ;;  %704 = vmatpush1.bf16.msra.mxu1 %v1083_v6 }
  0x63   :  { %705 = vmatprep.subr.bf16.mxu1 %v1087_v7 }
  0x65   :  { %751 = vmatpush1.bf16.msra.mxu0 %v1001_v53 }
  0x66   :  { %763 = vmatprep.subr.bf16.mxu0 %v1008_v54  ;;  %706 = vmatpush1.bf16.msra.mxu1 %v1089_v10 }
  0x67   :  { %707 = vmatprep.subr.bf16.mxu1 %v1093_v11 }
  0x68   :  { %753 = vmatmul.mubr.bf16.vlgmr.msra.gmra.mrb[0].mxu0 %v1003_v56 }
  0x69   :  { %764 = vmatpush1.bf16.msra.mxu0 %v1006_v58  ;;  %795 = vmatprep.mubr.bf16.mxu0 %v1104_v0 }
  0x6a   :  { %765 = vmatprep.subr.bf16.mxu0 %v1014_v59  ;;  %708 = vmatpush1.bf16.msra.mxu1 %v1095_v14 }
  0x6d   :  { %766 = vmatpush1.bf16.msra.mxu0 %v1012_v63  ;;  %710 = vmatmul.mubr.bf16.vlgmr.msra.gmra.mrb[0].mxu1 %v1096_v17 }
  0x6e   :  { %767 = vmatprep.subr.bf16.mxu0 %v1020_v1 }
  0x71   :  { %768 = vmatpush1.bf16.msra.mxu0 %v1018_v4 }
  0x72   :  { %769 = vmatprep.subr.bf16.mxu0 %v1026_v5 }
  0x75   :  { %770 = vmatpush1.bf16.msra.mxu0 %v1024_v8 }
  0x76   :  { %771 = vmatprep.subr.bf16.mxu0 %v1032_v9 }
  0x79   :  { %772 = vmatpush1.bf16.msra.mxu0 %v1030_v12 }
  0x7a   :  { %773 = vmatprep.subr.bf16.mxu0 %v1038_v13 }
  0x7d   :  { %774 = vmatpush1.bf16.msra.mxu0 %v1036_v15 }
  0x7e   :  { %775 = vmatprep.subr.bf16.mxu0 %v1044_v16 }
  0x81   :  { %776 = vmatpush1.bf16.msra.mxu0 %v1042_v18 }
  0x82   :  { %777 = vmatprep.subr.bf16.mxu0 %v1050_v19 }
  0x85   :  { %778 = vmatpush1.bf16.msra.mxu0 %v1048_v20 }
  0x86   :  { %779 = vmatprep.subr.bf16.mxu0 %v1056_v21 }
  0x89   :  { %780 = vmatpush1.bf16.msra.mxu0 %v1054_v22 }
  0x8a   :  { %781 = vmatprep.subr.bf16.mxu0 %v1062_v23 }
  0x8d   :  { %782 = vmatpush1.bf16.msra.mxu0 %v1060_v24 }
  0x8e   :  { %783 = vmatprep.subr.bf16.mxu0 %v1068_v25 }
  0x91   :  { %784 = vmatpush1.bf16.msra.mxu0 %v1066_v26 }
  0x92   :  { %785 = vmatprep.subr.bf16.mxu0 %v1074_v27 }
  0x95   :  { %786 = vmatpush1.bf16.msra.mxu0 %v1072_v28 }
  0x96   :  { %787 = vmatprep.subr.bf16.mxu0 %v1080_v29 }
  0x99   :  { %788 = vmatpush1.bf16.msra.mxu0 %v1078_v30 }
  0x9a   :  { %789 = vmatprep.subr.bf16.mxu0 %v1086_v31 }
  0x9d   :  { %790 = vmatpush1.bf16.msra.mxu0 %v1084_v32 }
  0x9e   :  { %791 = vmatprep.subr.bf16.mxu0 %v1092_v33 }
  0xa1   :  { %792 = vmatpush1.bf16.msra.mxu0 %v1090_v34 }
  0xa2   :  { %793 = vmatprep.subr.bf16.mxu0 %v1101_v35 }
  0xa5   :  { %794 = vmatpush1.bf16.msra.mxu0 %v1099_v36 }
  0xa8   :  { %796 = vmatmul.mubr.bf16.vlgmr.msra.gmra.mrb[0].mxu0 %v1102_v37 }
 0x140   :  { %v711_v38 = vpop.f32.mrb[0].mxu1 }
 0x141   :  { %v713_v39 = vpop.f32.mrb[1].mxu1 }
 0x142   :  { %v715_v40 = vpop.f32.mrb[2].mxu1 }
 0x143   :  { %v717_v41 = vpop.f32.mrb[3].mxu1 }
 0x17b   :  { %v797_v42 = vpop.f32.mrb[0].mxu0 }
 0x17c   :  { %v934_v43 = vadd.f32 %v797_v42, %v711_v38  ;;  %v799_v44 = vpop.f32.mrb[1].mxu0 }
 0x17d   :  { %v935_v45 = vadd.f32 %v799_v44, %v713_v39  ;;  %v801_v46 = vpop.f32.mrb[2].mxu0 }
 0x17e   :  { %v936_v47 = vadd.f32 %v801_v46, %v715_v40  ;;  %v803_v48 = vpop.f32.mrb[3].mxu0  ;;  %810 = vst [vmem:[#allocation7] sm:$0xff] %v934_v43 }
 0x17f   :  { %v937_v49 = vadd.f32 %v803_v48, %v717_v41  ;;  %811 = vst [vmem:[#allocation7 + $0x8] sm:$0xff] %v935_v45 }
 0x180   :  { %812 = vst [vmem:[#allocation7 + $0x10] sm:$0xff] %v936_v47 }
 0x181   :  { %813 = vst [vmem:[#allocation7 + $0x18] sm:$0xff] %v937_v49 }
 0x182   :  { %1160 = shalt.err (!%p1157_p6)
}
 0x183   :  { %s1161_s12 = scalar_lea.hbm %s1239_s2, 512 }
 0x184   :  { %p1162_p7 = scmp.ne.s32.totalorder %s1239_s2, %s1161_s12  ;;  %p1165_p8 = scmp.lt.u32.totalorder %s1161_s12, %s1239_s2 }
 0x186   :  { %p1167_p9 = pnand %p1165_p8, %p1162_p7 }
 0x188   :  { %1170 = shalt.err (!%p1167_p9)
}
 0x189   :  { %s1184_s17 = smov 256   ;;  %s1185_s18 = smov 16  }
 0x18a   :  { %825 = dma.vmem_to_hbm [thread:$0]  %s820_s8, 512, %s1239_s2, [#allocation4], %s1184_s17, %s1184_s17, %s1185_s18  }
 0x18b   :  { %1175 = dma.done.wait [#allocation4], 512  }
 0x18c   :  { %1176 = vsyncadd [#allocation4], 4294966784 }
 0x18d   :  { %829 = vsyncpa [#allocation3], 1 }
 0x18e   :  { %830 = vsyncpa [#allocation6], 1 }
 0x18f   :  { %831 = vsyncpa [#allocation4], 1 }

</bundles_post_ra>
